<compile_context>
chip_gen: v7x
topology: tpu7x:2x2x1
jax: 0.10.0
libtpu: 0.0.40
codegen_flags: <defaults>
</compile_context>

<pallas_src>
import math

import jax
import jax.numpy as jnp
from jax.experimental import pallas as pl
from jax.experimental.pallas import tpu as pltpu

# ---- config (small, consistent with the module) ----
BATCH = 2
SEQ = 8
HIDDEN = 32
NUM_HEADS = 4
HEAD_DIM = HIDDEN // NUM_HEADS  # 8


def _make_kernel(output_attentions: bool, compute_dtype):
    """Kernel factory: one grid step handles one batch element."""

    def kernel(x_ref, mask_ref, wqkv_ref, bqkv_ref, ctx_ref, *rest):
        probs_ref = rest[0] if output_attentions else None

        x = x_ref[0]                       # (S, H), matmul dtype (f32 or bf16)
        mask = mask_ref[0]                 # (1, S), f32 additive mask

        # Fused Q/K/V projection: one MXU matmul.  1/sqrt(HD) is already baked
        # into the Q slice of wqkv/bqkv, accumulation in f32.
        qkv = jnp.dot(x, wqkv_ref[...], preferred_element_type=jnp.float32)
        qkv = qkv + bqkv_ref[0]            # (S, 3H) f32

        for h in range(NUM_HEADS):         # static unroll; direct stores below
            c = h * HEAD_DIM
            qh = qkv[:, c:c + HEAD_DIM].astype(compute_dtype)
            kh = qkv[:, HIDDEN + c:HIDDEN + c + HEAD_DIM].astype(compute_dtype)
            vh = qkv[:, 2 * HIDDEN + c:2 * HIDDEN + c + HEAD_DIM].astype(compute_dtype)

            # scores = qh @ kh^T: contract last axes on the MXU, no transpose.
            scores = jax.lax.dot_general(
                qh, kh, (((1,), (1,)), ((), ())),
                preferred_element_type=jnp.float32)            # (S, S)
            scores = scores + mask                             # (1,S) broadcast

            # Numerically stable softmax, f32 throughout.
            m = jnp.max(scores, axis=-1, keepdims=True)
            e = jnp.exp(scores - m)
            denom = jnp.sum(e, axis=-1, keepdims=True)
            p = e * pl.reciprocal(denom, approx=False)

            # TODO(synk): attention-probs dropout is identity at inference (no
            # RNG applied) and only the head_mask=None path is implemented.

            ctx_h = jnp.dot(p.astype(compute_dtype), vh,
                            preferred_element_type=jnp.float32)  # (S, HD)

            # Direct stores -- no concatenate chains, no wrapper re-layout.
            ctx_ref[0, :, c:c + HEAD_DIM] = ctx_h.astype(ctx_ref.dtype)
            if output_attentions:
                probs_ref[0, h] = p.astype(probs_ref.dtype)

    return kernel


def bert_self_attention(hidden_states, attention_mask, wq, bq, wk, bk, wv, bv,
                        *, output_attentions=True, matmul_dtype=jnp.float32):
    """hidden_states: (B, S, H) f32.
       attention_mask: (B, 1, 1, S) additive extended mask (HF convention).
       wq/wk/wv: (H, H) PyTorch (out, in) weights; bq/bk/bv: (H,)."""
    B, S, H = hidden_states.shape
    NH, HD = NUM_HEADS, HEAD_DIM
    inv_sqrt = 1.0 / math.sqrt(HD)

    # Fused QKV weight/bias; bake the 1/sqrt(HD) scale into the Q slice.
    wqkv = jnp.concatenate([wq.T * inv_sqrt, wk.T, wv.T],
                           axis=1).astype(matmul_dtype)          # (H, 3H)
    bqkv = jnp.concatenate([bq * inv_sqrt, bk, bv])[None, :].astype(jnp.float32)

    x = hidden_states.astype(matmul_dtype)                       # (B, S, H)
    mask = attention_mask.reshape(B, 1, S).astype(jnp.float32)   # compact mask

    kernel = _make_kernel(output_attentions, matmul_dtype)

    vmem = pltpu.MemorySpace.VMEM
    in_specs = [
        pl.BlockSpec((1, S, H), lambda b: (b, 0, 0), memory_space=vmem),   # x
        pl.BlockSpec((1, 1, S), lambda b: (b, 0, 0), memory_space=vmem),   # mask
        pl.BlockSpec((H, 3 * H), lambda b: (0, 0), memory_space=vmem),     # wqkv (resident)
        pl.BlockSpec((1, 3 * H), lambda b: (0, 0), memory_space=vmem),     # bqkv (resident)
    ]
    ctx_spec = pl.BlockSpec((1, S, H), lambda b: (b, 0, 0), memory_space=vmem)
    ctx_shape = jax.ShapeDtypeStruct((B, S, H), hidden_states.dtype)

    if output_attentions:
        out_specs = (ctx_spec,
                     pl.BlockSpec((1, NH, S, S), lambda b: (b, 0, 0, 0),
                                  memory_space=vmem))
        out_shape = (ctx_shape,
                     jax.ShapeDtypeStruct((B, NH, S, S), jnp.float32))
    else:
        out_specs = ctx_spec
        out_shape = ctx_shape

    itemsize = jnp.dtype(matmul_dtype).itemsize
    flops = B * (2 * S * H * 3 * H) + B * NH * (2 * 2 * S * S * HD)
    transcendentals = B * NH * S * S
    bytes_accessed = (itemsize * (B * S * H + H * 3 * H)
                      + 4 * (B * S + 3 * H + B * S * H
                             + (B * NH * S * S if output_attentions else 0)))

    result = pl.pallas_call(
        kernel,
        grid=(B,),
        in_specs=in_specs,
        out_specs=out_specs,
        out_shape=out_shape,
        compiler_params=pltpu.CompilerParams(
            dimension_semantics=("parallel",)),
        cost_estimate=pl.CostEstimate(
            flops=flops, transcendentals=transcendentals,
            bytes_accessed=bytes_accessed),
    )(x, mask, wqkv, bqkv)

    if output_attentions:
        ctx, probs = result
        return ctx, probs
    return (result,)


def _reference(hidden_states, attention_mask, wq, bq, wk, bk, wv, bv):
    """Plain-JAX reference mirroring the PyTorch forward exactly."""
    B, S, H = hidden_states.shape
    q = hidden_states @ wq.T + bq
    k = hidden_states @ wk.T + bk
    v = hidden_states @ wv.T + bv

    def split(t):
        return t.reshape(B, S, NUM_HEADS, HEAD_DIM).transpose(0, 2, 1, 3)

    qh, kh, vh = split(q), split(k), split(v)
    scores = jnp.einsum('bnqd,bnkd->bnqk', qh, kh) / math.sqrt(HEAD_DIM)
    scores = scores + attention_mask                 # (B,1,1,S) broadcasts
    probs = jax.nn.softmax(scores, axis=-1)
    ctx = jnp.einsum('bnqk,bnkd->bnqd', probs, vh)
    ctx = ctx.transpose(0, 2, 1, 3).reshape(B, S, H)
    return ctx, probs


if __name__ == "__main__":
    key = jax.random.PRNGKey(0)
    k_x, k_m, k_wq, k_bq, k_wk, k_bk, k_wv, k_bv = jax.random.split(key, 8)

    hidden_states = jax.random.normal(k_x, (BATCH, SEQ, HIDDEN), jnp.float32)

    # Extended additive attention mask: 0 for attended positions, -10000 masked.
    keep = (jax.random.uniform(k_m, (BATCH, 1, 1, SEQ)) > 0.2).astype(jnp.float32)
    attention_mask = (1.0 - keep) * -10000.0          # (B, 1, 1, S)

    scale = 1.0 / math.sqrt(HIDDEN)
    wq = jax.random.normal(k_wq, (HIDDEN, HIDDEN), jnp.float32) * scale
    bq = jax.random.normal(k_bq, (HIDDEN,), jnp.float32) * 0.02
    wk = jax.random.normal(k_wk, (HIDDEN, HIDDEN), jnp.float32) * scale
    bk = jax.random.normal(k_bk, (HIDDEN,), jnp.float32) * 0.02
    wv = jax.random.normal(k_wv, (HIDDEN, HIDDEN), jnp.float32) * scale
    bv = jax.random.normal(k_bv, (HIDDEN,), jnp.float32) * 0.02

    ctx_ref, probs_ref = _reference(hidden_states, attention_mask,
                                    wq, bq, wk, bk, wv, bv)

    # f32-operand path: tight tolerances against the PyTorch-equivalent ref.
    ctx, probs = bert_self_attention(hidden_states, attention_mask,
                                     wq, bq, wk, bk, wv, bv,
                                     output_attentions=True,
                                     matmul_dtype=jnp.float32)
    jax.block_until_ready((ctx, probs))
    assert jnp.allclose(ctx, ctx_ref, atol=1e-4, rtol=1e-4)
    assert jnp.allclose(probs, probs_ref, atol=1e-5, rtol=1e-5)

    # output_attentions=False path (probs never materialized).
    (ctx_only,) = bert_self_attention(hidden_states, attention_mask,
                                      wq, bq, wk, bk, wv, bv,
                                      output_attentions=False,
                                      matmul_dtype=jnp.float32)
    jax.block_until_ready(ctx_only)
    assert jnp.allclose(ctx_only, ctx_ref, atol=1e-4, rtol=1e-4)

    # bf16 matmul-operand path (v6e/v7x MXU throughput; f32 accumulation and
    # f32 softmax).  Loose tolerances cover operand-rounding error only.
    ctx_bf, probs_bf = bert_self_attention(hidden_states, attention_mask,
                                           wq, bq, wk, bk, wv, bv,
                                           output_attentions=True,
                                           matmul_dtype=jnp.bfloat16)
    jax.block_until_ready((ctx_bf, probs_bf))
    assert jnp.allclose(ctx_bf, ctx_ref, atol=1e-1, rtol=1e-1)
    assert jnp.allclose(probs_bf, probs_ref, atol=5e-2, rtol=1e-1)

    print("KERNEL_OK")
</pallas_src>

<mosaic_0001>
module attributes {stable_mosaic.version = 11 : i64} {
  func.func @kernel(%arg0: i32, %arg1: memref<1x8x32xf32, #tpu.memory_space<vmem>>, %arg2: memref<1x1x8xf32, #tpu.memory_space<vmem>>, %arg3: memref<32x96xf32, #tpu.memory_space<vmem>>, %arg4: memref<1x96xf32, #tpu.memory_space<vmem>>, %arg5: memref<1x8x32xf32, #tpu.memory_space<vmem>>, %arg6: memref<1x4x8x8xf32, #tpu.memory_space<vmem>>) attributes {dimension_semantics = [#tpu.dimension_semantics<parallel>], iteration_bounds = array<i64: 2>, scalar_prefetch = 0 : i64, scratch_operands = 0 : i64, tpu.core_type = #tpu.core_type<tc>, window_params = [{transform_indices = @transform_0, window_bounds = array<i64: 1, 8, 32>}, {transform_indices = @transform_1, window_bounds = array<i64: 1, 1, 8>}, {pipeline_mode = #tpu.pipeline_mode<synchronous>, transform_indices = @transform_2, window_bounds = array<i64: 32, 96>}, {pipeline_mode = #tpu.pipeline_mode<synchronous>, transform_indices = @transform_3, window_bounds = array<i64: 1, 96>}, {transform_indices = @transform_4, window_bounds = array<i64: 1, 8, 32>}, {transform_indices = @transform_5, window_bounds = array<i64: 1, 4, 8, 8>}]} {
    %c0 = arith.constant 0 : index
    %c0_0 = arith.constant 0 : index
    %c0_1 = arith.constant 0 : index
    %0 = vector.load %arg1[%c0, %c0_0, %c0_1] : memref<1x8x32xf32, #tpu.memory_space<vmem>>, vector<1x8x32xf32>
    %1 = vector.shape_cast %0 : vector<1x8x32xf32> to vector<8x32xf32>
    %c0_2 = arith.constant 0 : index
    %c0_3 = arith.constant 0 : index
    %c0_4 = arith.constant 0 : index
    %2 = vector.load %arg2[%c0_2, %c0_3, %c0_4] : memref<1x1x8xf32, #tpu.memory_space<vmem>>, vector<1x1x8xf32>
    %3 = vector.shape_cast %2 : vector<1x1x8xf32> to vector<1x8xf32>
    %c0_5 = arith.constant 0 : index
    %c0_6 = arith.constant 0 : index
    %4 = vector.load %arg3[%c0_5, %c0_6] : memref<32x96xf32, #tpu.memory_space<vmem>>, vector<32x96xf32>
    %cst = arith.constant dense<0.000000e+00> : vector<8x96xf32>
    %5 = tpu.matmul %1, %4, %cst {dimension_numbers = #tpu.dot_dimension_numbers<[1], [0], [0], [1], [0, 0, 1, 1], [], []>} : vector<8x32xf32>, vector<32x96xf32>, vector<8x96xf32> -> vector<8x96xf32>
    %c0_7 = arith.constant 0 : index
    %c0_8 = arith.constant 0 : index
    %6 = vector.load %arg4[%c0_7, %c0_8] : memref<1x96xf32, #tpu.memory_space<vmem>>, vector<1x96xf32>
    %7 = vector.shape_cast %6 : vector<1x96xf32> to vector<96xf32>
    %8 = vector.shape_cast %7 : vector<96xf32> to vector<1x96xf32>
    %9 = vector.broadcast %8 : vector<1x96xf32> to vector<8x96xf32>
    %10 = arith.addf %5, %9 : vector<8x96xf32>
    %11 = vector.extract_strided_slice %10 {offsets = [0, 0], sizes = [8, 8], strides = [1, 1]} : vector<8x96xf32> to vector<8x8xf32>
    %12 = vector.extract_strided_slice %10 {offsets = [0, 32], sizes = [8, 8], strides = [1, 1]} : vector<8x96xf32> to vector<8x8xf32>
    %13 = vector.extract_strided_slice %10 {offsets = [0, 64], sizes = [8, 8], strides = [1, 1]} : vector<8x96xf32> to vector<8x8xf32>
    %cst_9 = arith.constant dense<0.000000e+00> : vector<8x8xf32>
    %14 = tpu.matmul %11, %12, %cst_9 {dimension_numbers = #tpu.dot_dimension_numbers<[1], [1], [0], [0], [0, 0, 1, 0], [], []>} : vector<8x8xf32>, vector<8x8xf32>, vector<8x8xf32> -> vector<8x8xf32>
    %15 = vector.broadcast %3 : vector<1x8xf32> to vector<8x8xf32>
    %16 = arith.addf %14, %15 : vector<8x8xf32>
    %cst_10 = arith.constant dense<0xFF800000> : vector<8xf32>
    %17 = vector.multi_reduction <maximumf>, %16, %cst_10 [1] : vector<8x8xf32> to vector<8xf32>
    %18 = vector.shape_cast %17 : vector<8xf32> to vector<8x1xf32>
    %19 = vector.broadcast %18 : vector<8x1xf32> to vector<8x8xf32>
    %20 = arith.subf %16, %19 : vector<8x8xf32>
    %21 = math.exp %20 : vector<8x8xf32>
    %cst_11 = arith.constant dense<0.000000e+00> : vector<8xf32>
    %22 = vector.multi_reduction <add>, %21, %cst_11 [1] : vector<8x8xf32> to vector<8xf32>
    %23 = vector.shape_cast %22 : vector<8xf32> to vector<8x1xf32>
    %24 = tpu.reciprocal %23 : vector<8x1xf32> -> vector<8x1xf32>
    %25 = vector.broadcast %24 : vector<8x1xf32> to vector<8x8xf32>
    %26 = arith.mulf %21, %25 : vector<8x8xf32>
    %cst_12 = arith.constant dense<0.000000e+00> : vector<8x8xf32>
    %27 = tpu.matmul %26, %13, %cst_12 {dimension_numbers = #tpu.dot_dimension_numbers<[1], [0], [0], [1], [0, 0, 1, 1], [], []>} : vector<8x8xf32>, vector<8x8xf32>, vector<8x8xf32> -> vector<8x8xf32>
    %c0_13 = arith.constant 0 : index
    %c0_14 = arith.constant 0 : index
    %c0_15 = arith.constant 0 : index
    %28 = vector.load %arg5[%c0_13, %c0_14, %c0_15] : memref<1x8x32xf32, #tpu.memory_space<vmem>>, vector<1x8x8xf32>
    %29 = vector.shape_cast %28 : vector<1x8x8xf32> to vector<8x8xf32>
    %30 = vector.shape_cast %27 : vector<8x8xf32> to vector<1x8x8xf32>
    tpu.vector_store %arg5[%c0_13, %c0_14, %c0_15], %30 {strides = array<i32>} : memref<1x8x32xf32, #tpu.memory_space<vmem>>, vector<1x8x8xf32>,
    %c0_16 = arith.constant 0 : index
    %c0_17 = arith.constant 0 : index
    %c0_18 = arith.constant 0 : index
    %c0_19 = arith.constant 0 : index
    %31 = vector.load %arg6[%c0_16, %c0_17, %c0_18, %c0_19] : memref<1x4x8x8xf32, #tpu.memory_space<vmem>>, vector<1x1x8x8xf32>
    %32 = vector.shape_cast %31 : vector<1x1x8x8xf32> to vector<8x8xf32>
    %33 = vector.shape_cast %26 : vector<8x8xf32> to vector<1x1x8x8xf32>
    tpu.vector_store %arg6[%c0_16, %c0_17, %c0_18, %c0_19], %33 {strides = array<i32>} : memref<1x4x8x8xf32, #tpu.memory_space<vmem>>, vector<1x1x8x8xf32>,
    %34 = vector.extract_strided_slice %10 {offsets = [0, 8], sizes = [8, 8], strides = [1, 1]} : vector<8x96xf32> to vector<8x8xf32>
    %35 = vector.extract_strided_slice %10 {offsets = [0, 40], sizes = [8, 8], strides = [1, 1]} : vector<8x96xf32> to vector<8x8xf32>
    %36 = vector.extract_strided_slice %10 {offsets = [0, 72], sizes = [8, 8], strides = [1, 1]} : vector<8x96xf32> to vector<8x8xf32>
    %cst_20 = arith.constant dense<0.000000e+00> : vector<8x8xf32>
    %37 = tpu.matmul %34, %35, %cst_20 {dimension_numbers = #tpu.dot_dimension_numbers<[1], [1], [0], [0], [0, 0, 1, 0], [], []>} : vector<8x8xf32>, vector<8x8xf32>, vector<8x8xf32> -> vector<8x8xf32>
    %38 = vector.broadcast %3 : vector<1x8xf32> to vector<8x8xf32>
    %39 = arith.addf %37, %38 : vector<8x8xf32>
    %cst_21 = arith.constant dense<0xFF800000> : vector<8xf32>
    %40 = vector.multi_reduction <maximumf>, %39, %cst_21 [1] : vector<8x8xf32> to vector<8xf32>
    %41 = vector.shape_cast %40 : vector<8xf32> to vector<8x1xf32>
    %42 = vector.broadcast %41 : vector<8x1xf32> to vector<8x8xf32>
    %43 = arith.subf %39, %42 : vector<8x8xf32>
    %44 = math.exp %43 : vector<8x8xf32>
    %cst_22 = arith.constant dense<0.000000e+00> : vector<8xf32>
    %45 = vector.multi_reduction <add>, %44, %cst_22 [1] : vector<8x8xf32> to vector<8xf32>
    %46 = vector.shape_cast %45 : vector<8xf32> to vector<8x1xf32>
    %47 = tpu.reciprocal %46 : vector<8x1xf32> -> vector<8x1xf32>
    %48 = vector.broadcast %47 : vector<8x1xf32> to vector<8x8xf32>
    %49 = arith.mulf %44, %48 : vector<8x8xf32>
    %cst_23 = arith.constant dense<0.000000e+00> : vector<8x8xf32>
    %50 = tpu.matmul %49, %36, %cst_23 {dimension_numbers = #tpu.dot_dimension_numbers<[1], [0], [0], [1], [0, 0, 1, 1], [], []>} : vector<8x8xf32>, vector<8x8xf32>, vector<8x8xf32> -> vector<8x8xf32>
    %c0_24 = arith.constant 0 : index
    %c0_25 = arith.constant 0 : index
    %c8 = arith.constant 8 : index
    %51 = vector.load %arg5[%c0_24, %c0_25, %c8] : memref<1x8x32xf32, #tpu.memory_space<vmem>>, vector<1x8x8xf32>
    %52 = vector.shape_cast %51 : vector<1x8x8xf32> to vector<8x8xf32>
    %53 = vector.shape_cast %50 : vector<8x8xf32> to vector<1x8x8xf32>
    tpu.vector_store %arg5[%c0_24, %c0_25, %c8], %53 {strides = array<i32>} : memref<1x8x32xf32, #tpu.memory_space<vmem>>, vector<1x8x8xf32>,
    %c0_26 = arith.constant 0 : index
    %c1 = arith.constant 1 : index
    %c0_27 = arith.constant 0 : index
    %c0_28 = arith.constant 0 : index
    %54 = vector.load %arg6[%c0_26, %c1, %c0_27, %c0_28] : memref<1x4x8x8xf32, #tpu.memory_space<vmem>>, vector<1x1x8x8xf32>
    %55 = vector.shape_cast %54 : vector<1x1x8x8xf32> to vector<8x8xf32>
    %56 = vector.shape_cast %49 : vector<8x8xf32> to vector<1x1x8x8xf32>
    tpu.vector_store %arg6[%c0_26, %c1, %c0_27, %c0_28], %56 {strides = array<i32>} : memref<1x4x8x8xf32, #tpu.memory_space<vmem>>, vector<1x1x8x8xf32>,
    %57 = vector.extract_strided_slice %10 {offsets = [0, 16], sizes = [8, 8], strides = [1, 1]} : vector<8x96xf32> to vector<8x8xf32>
    %58 = vector.extract_strided_slice %10 {offsets = [0, 48], sizes = [8, 8], strides = [1, 1]} : vector<8x96xf32> to vector<8x8xf32>
    %59 = vector.extract_strided_slice %10 {offsets = [0, 80], sizes = [8, 8], strides = [1, 1]} : vector<8x96xf32> to vector<8x8xf32>
    %cst_29 = arith.constant dense<0.000000e+00> : vector<8x8xf32>
    %60 = tpu.matmul %57, %58, %cst_29 {dimension_numbers = #tpu.dot_dimension_numbers<[1], [1], [0], [0], [0, 0, 1, 0], [], []>} : vector<8x8xf32>, vector<8x8xf32>, vector<8x8xf32> -> vector<8x8xf32>
    %61 = vector.broadcast %3 : vector<1x8xf32> to vector<8x8xf32>
    %62 = arith.addf %60, %61 : vector<8x8xf32>
    %cst_30 = arith.constant dense<0xFF800000> : vector<8xf32>
    %63 = vector.multi_reduction <maximumf>, %62, %cst_30 [1] : vector<8x8xf32> to vector<8xf32>
    %64 = vector.shape_cast %63 : vector<8xf32> to vector<8x1xf32>
    %65 = vector.broadcast %64 : vector<8x1xf32> to vector<8x8xf32>
    %66 = arith.subf %62, %65 : vector<8x8xf32>
    %67 = math.exp %66 : vector<8x8xf32>
    %cst_31 = arith.constant dense<0.000000e+00> : vector<8xf32>
    %68 = vector.multi_reduction <add>, %67, %cst_31 [1] : vector<8x8xf32> to vector<8xf32>
    %69 = vector.shape_cast %68 : vector<8xf32> to vector<8x1xf32>
    %70 = tpu.reciprocal %69 : vector<8x1xf32> -> vector<8x1xf32>
    %71 = vector.broadcast %70 : vector<8x1xf32> to vector<8x8xf32>
    %72 = arith.mulf %67, %71 : vector<8x8xf32>
    %cst_32 = arith.constant dense<0.000000e+00> : vector<8x8xf32>
    %73 = tpu.matmul %72, %59, %cst_32 {dimension_numbers = #tpu.dot_dimension_numbers<[1], [0], [0], [1], [0, 0, 1, 1], [], []>} : vector<8x8xf32>, vector<8x8xf32>, vector<8x8xf32> -> vector<8x8xf32>
    %c0_33 = arith.constant 0 : index
    %c0_34 = arith.constant 0 : index
    %c16 = arith.constant 16 : index
    %74 = vector.load %arg5[%c0_33, %c0_34, %c16] : memref<1x8x32xf32, #tpu.memory_space<vmem>>, vector<1x8x8xf32>
    %75 = vector.shape_cast %74 : vector<1x8x8xf32> to vector<8x8xf32>
    %76 = vector.shape_cast %73 : vector<8x8xf32> to vector<1x8x8xf32>
    tpu.vector_store %arg5[%c0_33, %c0_34, %c16], %76 {strides = array<i32>} : memref<1x8x32xf32, #tpu.memory_space<vmem>>, vector<1x8x8xf32>,
    %c0_35 = arith.constant 0 : index
    %c2 = arith.constant 2 : index
    %c0_36 = arith.constant 0 : index
    %c0_37 = arith.constant 0 : index
    %77 = vector.load %arg6[%c0_35, %c2, %c0_36, %c0_37] : memref<1x4x8x8xf32, #tpu.memory_space<vmem>>, vector<1x1x8x8xf32>
    %78 = vector.shape_cast %77 : vector<1x1x8x8xf32> to vector<8x8xf32>
    %79 = vector.shape_cast %72 : vector<8x8xf32> to vector<1x1x8x8xf32>
    tpu.vector_store %arg6[%c0_35, %c2, %c0_36, %c0_37], %79 {strides = array<i32>} : memref<1x4x8x8xf32, #tpu.memory_space<vmem>>, vector<1x1x8x8xf32>,
    %80 = vector.extract_strided_slice %10 {offsets = [0, 24], sizes = [8, 8], strides = [1, 1]} : vector<8x96xf32> to vector<8x8xf32>
    %81 = vector.extract_strided_slice %10 {offsets = [0, 56], sizes = [8, 8], strides = [1, 1]} : vector<8x96xf32> to vector<8x8xf32>
    %82 = vector.extract_strided_slice %10 {offsets = [0, 88], sizes = [8, 8], strides = [1, 1]} : vector<8x96xf32> to vector<8x8xf32>
    %cst_38 = arith.constant dense<0.000000e+00> : vector<8x8xf32>
    %83 = tpu.matmul %80, %81, %cst_38 {dimension_numbers = #tpu.dot_dimension_numbers<[1], [1], [0], [0], [0, 0, 1, 0], [], []>} : vector<8x8xf32>, vector<8x8xf32>, vector<8x8xf32> -> vector<8x8xf32>
    %84 = vector.broadcast %3 : vector<1x8xf32> to vector<8x8xf32>
    %85 = arith.addf %83, %84 : vector<8x8xf32>
    %cst_39 = arith.constant dense<0xFF800000> : vector<8xf32>
    %86 = vector.multi_reduction <maximumf>, %85, %cst_39 [1] : vector<8x8xf32> to vector<8xf32>
    %87 = vector.shape_cast %86 : vector<8xf32> to vector<8x1xf32>
    %88 = vector.broadcast %87 : vector<8x1xf32> to vector<8x8xf32>
    %89 = arith.subf %85, %88 : vector<8x8xf32>
    %90 = math.exp %89 : vector<8x8xf32>
    %cst_40 = arith.constant dense<0.000000e+00> : vector<8xf32>
    %91 = vector.multi_reduction <add>, %90, %cst_40 [1] : vector<8x8xf32> to vector<8xf32>
    %92 = vector.shape_cast %91 : vector<8xf32> to vector<8x1xf32>
    %93 = tpu.reciprocal %92 : vector<8x1xf32> -> vector<8x1xf32>
    %94 = vector.broadcast %93 : vector<8x1xf32> to vector<8x8xf32>
    %95 = arith.mulf %90, %94 : vector<8x8xf32>
    %cst_41 = arith.constant dense<0.000000e+00> : vector<8x8xf32>
    %96 = tpu.matmul %95, %82, %cst_41 {dimension_numbers = #tpu.dot_dimension_numbers<[1], [0], [0], [1], [0, 0, 1, 1], [], []>} : vector<8x8xf32>, vector<8x8xf32>, vector<8x8xf32> -> vector<8x8xf32>
    %c0_42 = arith.constant 0 : index
    %c0_43 = arith.constant 0 : index
    %c24 = arith.constant 24 : index
    %97 = vector.load %arg5[%c0_42, %c0_43, %c24] : memref<1x8x32xf32, #tpu.memory_space<vmem>>, vector<1x8x8xf32>
    %98 = vector.shape_cast %97 : vector<1x8x8xf32> to vector<8x8xf32>
    %99 = vector.shape_cast %96 : vector<8x8xf32> to vector<1x8x8xf32>
    tpu.vector_store %arg5[%c0_42, %c0_43, %c24], %99 {strides = array<i32>} : memref<1x8x32xf32, #tpu.memory_space<vmem>>, vector<1x8x8xf32>,
    %c0_44 = arith.constant 0 : index
    %c3 = arith.constant 3 : index
    %c0_45 = arith.constant 0 : index
    %c0_46 = arith.constant 0 : index
    %100 = vector.load %arg6[%c0_44, %c3, %c0_45, %c0_46] : memref<1x4x8x8xf32, #tpu.memory_space<vmem>>, vector<1x1x8x8xf32>
    %101 = vector.shape_cast %100 : vector<1x1x8x8xf32> to vector<8x8xf32>
    %102 = vector.shape_cast %95 : vector<8x8xf32> to vector<1x1x8x8xf32>
    tpu.vector_store %arg6[%c0_44, %c3, %c0_45, %c0_46], %102 {strides = array<i32>} : memref<1x4x8x8xf32, #tpu.memory_space<vmem>>, vector<1x1x8x8xf32>,
    return
  }
  func.func @transform_0(%arg0: i32) -> (i32, i32, i32) {
    %c0_i32 = arith.constant 0 : i32
    %c0_i32_0 = arith.constant 0 : i32
    %c0_i32_1 = arith.constant 0 : i32
    return %arg0, %c0_i32, %c0_i32_0 : i32, i32, i32
  }
  func.func @transform_1(%arg0: i32) -> (i32, i32, i32) {
    %c0_i32 = arith.constant 0 : i32
    %c0_i32_0 = arith.constant 0 : i32
    %c0_i32_1 = arith.constant 0 : i32
    return %arg0, %c0_i32, %c0_i32_0 : i32, i32, i32
  }
  func.func @transform_2(%arg0: i32) -> (i32, i32) {
    %c0_i32 = arith.constant 0 : i32
    %c0_i32_0 = arith.constant 0 : i32
    %c0_i32_1 = arith.constant 0 : i32
    return %c0_i32, %c0_i32_0 : i32, i32
  }
  func.func @transform_3(%arg0: i32) -> (i32, i32) {
    %c0_i32 = arith.constant 0 : i32
    %c0_i32_0 = arith.constant 0 : i32
    %c0_i32_1 = arith.constant 0 : i32
    return %c0_i32, %c0_i32_0 : i32, i32
  }
  func.func @transform_4(%arg0: i32) -> (i32, i32, i32) {
    %c0_i32 = arith.constant 0 : i32
    %c0_i32_0 = arith.constant 0 : i32
    %c0_i32_1 = arith.constant 0 : i32
    return %arg0, %c0_i32, %c0_i32_0 : i32, i32, i32
  }
  func.func @transform_5(%arg0: i32) -> (i32, i32, i32, i32) {
    %c0_i32 = arith.constant 0 : i32
    %c0_i32_0 = arith.constant 0 : i32
    %c0_i32_1 = arith.constant 0 : i32
    %c0_i32_2 = arith.constant 0 : i32
    return %arg0, %c0_i32, %c0_i32_0, %c0_i32_1 : i32, i32, i32, i32
  }
}

</mosaic_0001>

<bundles_post_ra>
// kernel: tpu_custom_call.1
= control target key start
LH: loop header
LB: loop body
LE: loop exit
PB: predicated region body
PF: predicated region fallthrough
CT: control target
= control target key end

     0   :  { %11 = vsyncpa [#allocation3], 0  ;;  %s1966_s0 = inlined_call_operand.hbm [shape: f32[2,8,32], index: 0, kind: input, shape index: {}]   ;;  %s1967_s1 = inlined_call_operand.vmem [shape: f32[2,1,8], index: 1, kind: input, shape index: {}]   ;;  %s1968_s2 = inlined_call_operand.hbm [shape: f32[32,96], index: 2, kind: input, shape index: {}]   ;;  %s1969_s3 = inlined_call_operand.vmem [shape: f32[1,96], index: 3, kind: input, shape index: {}]   ;;  %s1970_s4 = inlined_call_operand.hbm [shape: f32[2,8,32], index: 4, kind: output, shape index: {0}]   ;;  %s1971_s5 = inlined_call_operand.hbm [shape: f32[2,4,8,8], index: 5, kind: output, shape index: {1}]  }
   0x1   :  { %13 = vsyncpa [#allocation3 + $0x1], 0 }
   0x2   :  { %14 = vsyncpa [#allocation6], 0 }
   0x3   :  { %15 = vsyncpa [#allocation4], 0 }
   0x4   :  { %17 = vsyncpa [#allocation4 + $0x1], 0 }
   0x5   :  { %18 = vsyncpa [#allocation9], 0 }
   0x6   :  { %20 = vsyncpa [#allocation9 + $0x1], 0  ;;  %s1644_s18 = smov 0   ;;  %s1646_s19 = smov 0  }
   0x7   :  { %s1648_s20 = smov 0   ;;  %s1650_s21 = smov 0  }
   0x8 LB: > { %s1665_s22 = sadd.s32 4294967295, %s1588_s21   ;;  %s1215_s23 = sadd.s32 4294967294, %s1588_s21   ;;  %s1588_s21 = sphi %s1650_s21, %s1991_s21   ;;  %s1584_s20 = sphi %s1648_s20, %s1990_s20   ;;  %s1580_s19 = sphi %s1646_s19, %s1989_s19   ;;  %s1576_s18 = sphi %s1644_s18, %s1988_s18  }
   0x9   : > { %p46_p0 = scmp.ne.s32.totalorder %s1580_s19, %s1576_s18  ;;  %p1972_p1 = scmp.eq.s32.totalorder %s1665_s22, 0 }
   0xa   : > { %p144_p3 = scmp.eq.s32.totalorder %s1215_s23, 1  ;;  %p1216_p5 = scmp.ge.s32.totalorder %s1588_s21, 1 }
   0xb   : > { %p1674_p4 = por %p1972_p1, %p46_p0  ;;  %p177_p7 = scmp.lt.s32.totalorder %s1588_s21, 3 }
   0xc   : > { %p1679_p6 = por %p144_p3, %p46_p0  ;;  %s1590_s27 = smov [#allocation5]  }
   0xd   : > { %s1975_s24 = scalar_select %p1674_p4, 1, 0 }
   0xe   : > { %s1976_s25 = scalar_select %p1679_p6, 1, 0 }
   0xf   : > { %p1684_p8 = pnand %p1216_p5, %p177_p7  ;;  %s189_s28 = sshll.u32 %s1590_s27, 4  ;;  %s1688_s28 = int_to_ptr.vmem [resolvable:$true] %s189_s28 }
  0x10   : > { %s1700_s30 = sadd.s32 1, %s1588_s21   ;;  %s33_s6 = sadd.s32 1, %s1584_s20 }
  0x11   : > { %s1977_s26 = scalar_select %p1684_p8, 1, 0 }
  0x12   : > { %p1340_p9 = pneg %p1684_p8  ;;  %s30_s7 = ssub.s32 %s1588_s21, %s1700_s30 }
  0x13   : > { %s1428_s10 = scalar_lea.hbm %s1968_s2, 512 }
  0x14   : > { %p1695_p11 = pnand %p1340_p9, %p1972_p1  ;;  %p1429_p12 = scmp.ne.s32.totalorder %s1968_s2, %s1428_s10 }
  0x15   : > { %p1435_p5 = scmp.lt.u32.totalorder %s1428_s10, %s1968_s2 }
  0x16   : > { %p1430_p13 = pneg %p1695_p11 }
  0x18   : > { %p1431_p0 = pnand %p1430_p13, %p1429_p12 }
  0x1a   : > { %p1432_p3 = pneg %p1431_p0 }
  0x1c   : > { %p1437_p7 = pnand %p1435_p5, %p1432_p3 }
  0x1e   : > { %1440 = shalt.err (!%p1437_p7)
}
  0x1f   : > { %s1441_s15 = scalar_lea.vmem %s1688_s28, 512  ;;  %p1449_p2 = scmp.lt.s32.totalorder %s1688_s28, %s1688_s28 }
  0x20   : > { %p1442_p9 = scmp.ne.s32.totalorder %s1688_s28, %s1441_s15  ;;  %p1450_p6 = scmp.lt.s32.totalorder %s1441_s15, %s1441_s15 }
  0x22   : > { %p1444_p10 = pnand %p1442_p9, %p1430_p13  ;;  %p1451_p4 = por %p1450_p6, %p1449_p2 }
  0x24   : > { %p1445_p1 = pneg %p1444_p10 }
  0x26   : > { %p1452_p8 = pnand %p1451_p4, %p1445_p1 }
  0x28   : > { %1455 = shalt.err (!%p1452_p8)
}
  0x29   : > { %s1591_s16 = smov 128   ;;  %s1592_s17 = smov 8  }
  0x2a   : > { %1343 = dma.hbm_to_vmem [thread:$0]  (!%p1695_p11), %s1968_s2, 512, %s1688_s28, [#allocation6], %s1591_s16, %s1591_s16, %s1592_s17  }
  0x2b   : > { %p31_p2 = scmp.eq.s32.totalorder %s30_s7, 0  ;;  %p40_p1 = scmp.ne.s32.totalorder %s1584_s20, %s1580_s19 }
  0x2c   : > { %p41_p4 = scmp.eq.s32.totalorder %s1588_s21, 0  ;;  %p1356_p6 = scmp.lt.s32.totalorder %s1588_s21, 2 }
  0x2d   : > { %s1731_s8 = scalar_select %p31_p2, %s1584_s20, %s33_s6  }
  0x2e   : > { %p42_p8 = por %p41_p4, %p40_p1  ;;  %p1979_p10 = scmp.eq.s32.totalorder %s1665_s22, 1 }
  0x2f   : > { %s206_s10 = sand.u32 1, %s1584_s20   ;;  %s1220_s11 = sshll.u32 %s1588_s21, 7 }
  0x30   : > { %p1735_p12 = por %p1979_p10, %p40_p1  ;;  %s1219_s12 = sshll.u32 %s206_s10, 3 }
  0x31   : > { %s1744_s14 = scalar_lea.hbm %s1966_s0, %s1220_s11  ;;  %s210_s28 = scalar_lea.vmem [#allocation2], %s1219_s12 }
  0x32   : > { %s217_s6 = sshll.u32 %s210_s28, 4  ;;  %p1746_p11 = pnand %p1356_p6, %p42_p8  ;;  %s1750_s6 = int_to_ptr.vmem [resolvable:$true] %s217_s6 }
  0x33   : > { %s207_s15 = scalar_lea.sflag [#allocation3], %s206_s10  ;;  %s1456_s16 = scalar_lea.hbm %s1744_s14, 128 }
  0x34   : > { %p1457_p13 = scmp.ne.s32.totalorder %s1744_s14, %s1456_s16  ;;  %p1458_p0 = pneg %p1746_p11 }
  0x35   : > { %s1461_s27 = scalar_lea.hbm %s1966_s0, 256  ;;  %p1462_p7 = scmp.lt.u32.totalorder %s1744_s14, %s1966_s0 }
  0x36   : > { %p1459_p3 = pnand %p1458_p0, %p1457_p13  ;;  %p1463_p9 = scmp.lt.u32.totalorder %s1461_s27, %s1456_s16 }
  0x37   : > { %p1465_p1 = scmp.lt.u32.totalorder %s1456_s16, %s1744_s14 }
  0x38   : > { %p1460_p5 = pneg %p1459_p3  ;;  %p1464_p2 = por %p1463_p9, %p1462_p7 }
  0x3a   : > { %p1466_p4 = por %p1465_p1, %p1464_p2 }
  0x3c   : > { %p1467_p6 = pnand %p1466_p4, %p1460_p5 }
  0x3e   : > { %1470 = shalt.err (!%p1467_p6)
}
  0x3f   : > { %s1471_s10 = scalar_lea.vmem %s1750_s6, 128  ;;  %s1593_s29 = smov [#allocation2]  }
  0x40   : > { %p1472_p8 = scmp.ne.s32.totalorder %s1750_s6, %s1471_s10  ;;  %s1476_s13 = sshll.u32 %s1593_s29, 4  ;;  %s1477_s13 = int_to_ptr.vmem [resolvable:$false] %s1476_s13 }
  0x41   : > { %s1478_s28 = scalar_lea.vmem %s1477_s13, 256  ;;  %p1479_p3 = scmp.lt.s32.totalorder %s1750_s6, %s1477_s13 }
  0x42   : > { %p1474_p10 = pnand %p1472_p8, %p1458_p0  ;;  %p1480_p7 = scmp.lt.s32.totalorder %s1478_s28, %s1471_s10 }
  0x44   : > { %p1475_p13 = pneg %p1474_p10  ;;  %p1481_p9 = por %p1480_p7, %p1479_p3 }
  0x46   : > { %p1482_p2 = pnand %p1481_p9, %p1475_p13 }
  0x48   : > { %1485 = shalt.err (!%p1482_p2)
}
  0x49   : > { %1347 = dma.hbm_to_vmem [thread:$0]  (!%p1746_p11), %s1744_s14, 128, %s1750_s6, %s207_s15  }
  0x4a   : > { %p1982_p5 = scmp.ne.s32.totalorder %s1977_s26, 0 }
  0x4b   : > { %s1780_s16 = sand.u32 (!%p1982_p5), 1, %s1580_s19   ;;  %p1983_p0 = scmp.ne.s32.totalorder (!%p1982_p5), %s1975_s24, 0 }
  0x4c   : > { %232 = sbr.rel (%p1982_p5) target bundleno = 1355 (0x54b), region = 36  ;;  %s1222_s17 = sshll.u32 (!%p1982_p5), %s1780_s16, 3 }
  0x4d   : > { %s235_s23 = scalar_lea.sflag (!%p1982_p5), [#allocation3], %s1780_s16  ;;  %s238_s27 = scalar_lea.vmem (!%p1982_p5), [#allocation2], %s1222_s17 }
  0x53   : > { %1559 = dma.done.wait (%p1983_p0), %s235_s23, 128  }
  0x54   : > { %1561 = vsyncadd (%p1983_p0), %s235_s23, 4294967168  ;;  %p1984_p11 = scmp.eq.s32.totalorder %s1665_s22, 0 }
  0x56   : > { %1563 = dma.done.wait (%p1984_p11), [#allocation6], 512   ;;  %p1985_p1 = pmov %p1984_p11 }
  0x57   : > { %v1594_v0 = vmov 0.0|0.0   ;;  %vm1595_vm0 = vmmov 0   ;;  %v1596_v1 = vmov 0.0   ;;  %v282_v2 = vld [vmem:[#allocation5] sm:$0xff]  ;;  %v283_v3 = vld [vmem:[#allocation5 + $0x8] sm:$0xff]  ;;  %v284_v4 = vld [vmem:[#allocation5 + $0x10] sm:$0xff] }
  0x58   : > { %1565 = vsyncadd (%p1985_p1), [#allocation6], 4294966784  ;;  %1324 = vmatprep.subr.bf16.mxu0 %v1594_v0  ;;  %1281 = vmatprep.mubr.msk.f32.mxu0 %vm1595_vm0, %v1596_v1  ;;  %v1325_v5 = vpack.c.bf16 %v283_v3, %v282_v2  ;;  %v285_v6 = vld [vmem:[#allocation5 + $0x18] sm:$0xff]  ;;  %vm293_vm1 = vcmask 261120   ;;  %v1226_v9 = vld [vmem:[%s1969_s3] ss:$0 sm:$0xff] }
  0x59   : > { %1284 = vmatprep.subr.mxu1 %v1596_v1  ;;  %1286 = vmatprep.mubr.msk.f32.mxu1 %vm1595_vm0, %v1596_v1  ;;  %v1328_v7 = vpack.c.bf16 %v285_v6, %v284_v4  ;;  %v280_v8 = vld [vmem:[%s238_s27] sm:$0xff]  ;;  %s1597_s14 = smov 120   ;;  %s1598_s6 = smov 96   ;;  %vm376_vm2 = vcmask 64512  }
  0x5a   : > { %1326 = vmatpush3.bf16.msra.mxu0 %v1325_v5  ;;  %s1599_s7 = smov 80   ;;  %s1600_s15 = smov 88  }
  0x5b   : > { %1327 = vmatprep.subr.bf16.mxu0 %v1594_v0  ;;  %s1601_s11 = smov 72   ;;  %s1602_s12 = smov 112  }
  0x5c   : > { %s1603_s10 = smov 104   ;;  %p277_p4 = scmp.lt.s32.totalorder %s1665_s22, 1 }
  0x5d   : > { %s1604_s27 = smov 56   ;;  %s1605_s24 = smov 64  }
  0x5e   : > { %1329 = vmatpush3.bf16.msra.mxu0 %v1328_v7  ;;  %s278_s29 = scalar_select %p277_p4, %s1665_s22, 1 }
  0x5f   : > { %1294 = vmatprep.subr.mxu0 %v1596_v1  ;;  %s1606_s26 = smov 48  }
  0x60   : > { %s279_s23 = scalar_lea.vmem %s1967_s1, %s278_s29 }
  0x61   : > { %1282 = vmatmul.mubr.msk.f32.vlgmr.msra.gmra.mrb[0].mxu0 %vm293_vm1, %v280_v8  ;;  %v1228_v20 = vld [vmem:[%s279_s23] ss:$0 sm:$0xff] }
  0x62   : > { %1296 = vmatprep.mubr.msk.f32.mxu0 %vm1595_vm0, %v1596_v1 }
 0x134   : > { %v363_v10 = vpop.f32.mrb[0].mxu0 }
 0x135   : > { %v1805_v11 = vadd.f32 %v1226_v9, %v363_v10  ;;  %v1283_v12 = vpop.f32.mrb[1].mxu0 }
 0x137   : > { %540 = vrot.lane.b32.xlu1 %v1805_v11, %s1597_s14  ;;  %374 = vrot.lane.b32.xlu0 %v1805_v11, %s1598_s6  ;;  %s1607_s14 = smov 40   ;;  %s1225_s6 = sshll.u32 %s1780_s16, 5 }
 0x13b   : > { %715 = vrot.lane.b32.xlu1 %v1805_v11, %s1599_s7  ;;  %542 = vrot.lane.b32.xlu0 %v1805_v11, %s1600_s15  ;;  %s1851_s7 = scalar_lea.vmem [#allocation8], %s1225_s6  ;;  %s1875_s15 = scalar_lea.vmem [#allocation7], %s1222_s17 }
 0x13c   : > { %s1065_s17 = scalar_lea.sflag [#allocation9], %s1780_s16 }
 0x13f   : > { %888 = vrot.lane.b32.xlu1 %v1805_v11, %s1601_s11  ;;  %713 = vrot.lane.b32.xlu0 %v1805_v11, %s1602_s12  ;;  %s1608_s11 = smov 8   ;;  %s1251_s12 = sshll.u32 %s1665_s22, 9 }
 0x140   : > { %s1885_s28 = scalar_lea.hbm %s1971_s5, %s1251_s12 }
 0x143   : > { %886 = vrot.lane.b32.xlu0 %v1805_v11, %s1603_s10  ;;  %s1091_s10 = sshll.u32 %s1851_s7, 4  ;;  %s1887_s10 = int_to_ptr.vmem [resolvable:$true] %s1091_s10 }
 0x144   : > { %s1486_s23 = scalar_lea.vmem %s1887_s10, 512 }
 0x145   : > { %p1487_p6 = scmp.ne.s32.totalorder %s1887_s10, %s1486_s23 }
 0x147   : > { %p1488_p8 = pnand %p1487_p6, %p1735_p12 }
 0x149   : > { %p1489_p10 = pneg %p1488_p8 }
 0x1a9   : > { %v541_v13 = vpop.permute.xlu1 %540  ;;  %v375_v14 = vpop.permute.xlu0 %374 }
 0x1aa   : > { %1285 = vmatpush3.xpose.msk.msra.mxu1 %vm376_vm2, %v375_v14 }
 0x1ab   : > { %1289 = vmatprep.subr.mxu1 %v1596_v1 }
 0x1ad   : > { %1287 = vmatmul.mubr.msk.f32.vlgmr.msra.gmra.mrb[0].mxu1 %vm376_vm2, %v1805_v11  ;;  %v543_v15 = vpop.permute.xlu0 %542  ;;  %v716_v16 = vpop.permute.xlu1 %715 }
 0x1ae   : > { %1295 = vmatpush3.xpose.msk.msra.mxu0 %vm376_vm2, %v543_v15  ;;  %1291 = vmatprep.mubr.msk.f32.mxu1 %vm1595_vm0, %v1596_v1 }
 0x1af   : > { %1304 = vmatprep.subr.mxu0 %v1596_v1 }
 0x1b1   : > { %1297 = vmatmul.mubr.msk.f32.vlgmr.msra.gmra.mrb[2].mxu0 %vm376_vm2, %v541_v13  ;;  %v714_v17 = vpop.permute.xlu0 %713  ;;  %v889_v18 = vpop.permute.xlu1 %888 }
 0x1b2   : > { %1305 = vmatpush3.xpose.msk.msra.mxu0 %vm376_vm2, %v716_v16  ;;  %1306 = vmatprep.mubr.msk.f32.mxu0 %vm1595_vm0, %v1596_v1 }
 0x1b3   : > { %1314 = vmatprep.subr.mxu0 %v1596_v1 }
 0x1b5   : > { %1307 = vmatmul.mubr.msk.f32.vlgmr.msra.gmra.mrb[4].mxu0 %vm376_vm2, %v714_v17  ;;  %v887_v19 = vpop.permute.xlu0 %886 }
 0x1b6   : > { %1315 = vmatpush3.xpose.msk.msra.mxu0 %vm376_vm2, %v889_v18  ;;  %1316 = vmatprep.mubr.msk.f32.mxu0 %vm1595_vm0, %v1596_v1 }
 0x1b9   : > { %1317 = vmatmul.mubr.msk.f32.vlgmr.msra.gmra.mrb[6].mxu0 %vm376_vm2, %v887_v19 }
 0x280   : > { %v447_v21 = vpop.f32.mrb[0].mxu1 }
 0x281   : > { %v448_v22 = vadd.f32 %v1228_v20, %v447_v21  ;;  %v1288_v23 = vpop.f32.mrb[1].mxu1 }
 0x283   : > { %v451_v24 = vsel %vm376_vm2, %v448_v22, -inf }
 0x284   : > { %452 = vmax.xlane.f32.xlu1 %v451_v24  ;;  %v614_v25 = vpop.f32.mrb[2].mxu0 }
 0x285   : > { %v615_v26 = vadd.f32 %v1228_v20, %v614_v25  ;;  %v1298_v27 = vpop.f32.mrb[3].mxu0 }
 0x287   : > { %v618_v28 = vsel %vm376_vm2, %v615_v26, -inf }
 0x288   : > { %619 = vmax.xlane.f32.xlu0 %v618_v28  ;;  %v787_v29 = vpop.f32.mrb[4].mxu0 }
 0x289   : > { %v788_v30 = vadd.f32 %v1228_v20, %v787_v29  ;;  %v1308_v31 = vpop.f32.mrb[5].mxu0 }
 0x28b   : > { %v791_v32 = vsel %vm376_vm2, %v788_v30, -inf }
 0x28c   : > { %792 = vmax.xlane.f32.xlu0 %v791_v32  ;;  %v960_v33 = vpop.f32.mrb[6].mxu0 }
 0x28d   : > { %v961_v34 = vadd.f32 %v1228_v20, %v960_v33  ;;  %v1318_v35 = vpop.f32.mrb[7].mxu0 }
 0x28f   : > { %v964_v36 = vsel %vm376_vm2, %v961_v34, -inf }
 0x290   : > { %965 = vmax.xlane.f32.xlu1 %v964_v36 }
 0x2a1   : > { %629 = vrot.lane.b32.xlu1 %v1805_v11, %s1604_s27  ;;  %s1609_s27 = smov [#allocation8]  }
 0x311   : > { %v453_v37 = vpop.xlane.xlu1 %452 }
 0x312   : > { %v454_v38 = vsub.f32 %v448_v22, %v453_v37 }
 0x314   : > { %v455_v39 = vmul.f32 1.442695, %v454_v38 }
 0x315   : > { %v620_v40 = vpop.xlane.xlu0 %619 }
 0x316   : > { %1412 = vpow2.f32 %v455_v39  ;;  %v621_v41 = vsub.f32 %v615_v26, %v620_v40 }
 0x318   : > { %v622_v42 = vmul.f32 1.442695, %v621_v41 }
 0x319   : > { %v793_v52 = vpop.xlane.xlu0 %792 }
 0x31a   : > { %1414 = vpow2.f32 %v622_v42  ;;  %v794_v53 = vsub.f32 %v788_v30, %v793_v52 }
 0x31c   : > { %v795_v54 = vmul.f32 1.442695, %v794_v53 }
 0x31d   : > { %v966_v43 = vpop.xlane.xlu1 %965 }
 0x31e   : > { %v967_v44 = vsub.f32 %v961_v34, %v966_v43 }
 0x320   : > { %v1413_v45 = vpop.eup %1412  ;;  %v968_v46 = vmul.f32 1.442695, %v967_v44 }
 0x321   : > { %v457_v47 = vsel %vm376_vm2, %v1413_v45, 0.0  ;;  %v630_v57 = vpop.permute.xlu1 %629 }
 0x322   : > { %1416 = vpow2.f32 %v968_v46  ;;  %458 = vadd.xlane.f32.xlu0 %v457_v47 }
 0x323   : > { %1418 = vpow2.f32 %v795_v54 }
 0x324   : > { %v1415_v48 = vpop.eup %1414 }
 0x325   : > { %v624_v49 = vsel %vm376_vm2, %v1415_v48, 0.0 }
 0x326   : > { %625 = vadd.xlane.f32.xlu1 %v624_v49 }
 0x32c   : > { %v1417_v50 = vpop.eup %1416 }
 0x32d   : > { %v970_v51 = vsel %vm376_vm2, %v1417_v50, 0.0  ;;  %v1419_v55 = vpop.eup %1418 }
 0x32e   : > { %971 = vadd.xlane.f32.xlu1 %v970_v51  ;;  %v797_v56 = vsel %vm376_vm2, %v1419_v55, 0.0 }
 0x338   : > { %462 = vrot.lane.b32.xlu0 %v1805_v11, %s1605_s24  ;;  %s1490_s24 = sshll.u32 %s1609_s27, 4  ;;  %s1491_s24 = int_to_ptr.vmem [resolvable:$false] %s1490_s24 }
 0x339   : > { %p1493_p13 = scmp.lt.s32.totalorder %s1887_s10, %s1491_s24 }
 0x33f   : > { %802 = vrot.lane.b32.xlu1 %v1805_v11, %s1606_s26  ;;  %s1492_s26 = scalar_lea.vmem %s1491_s24, 1024 }
 0x340   : > { %p1494_p3 = scmp.lt.s32.totalorder %s1492_s26, %s1486_s23 }
 0x342   : > { %p1495_p7 = por %p1494_p3, %p1493_p13 }
 0x344   : > { %p1496_p9 = pnand %p1495_p7, %p1489_p10 }
 0x357   : > { %798 = vadd.xlane.f32.xlu0 %v797_v56 }
 0x36d   : > { %975 = vrot.lane.b32.xlu0 %v1805_v11, %s1607_s14 }
 0x3af   : > { %v459_v58 = vpop.xlane.xlu0 %458 }
 0x3b0   : > { %1420 = vrcp.f32 %v459_v58 }
 0x3b3   : > { %v463_v59 = vpop.permute.xlu0 %462  ;;  %v626_v60 = vpop.xlane.xlu1 %625 }
 0x3b4   : > { %1422 = vrcp.f32 %v626_v60  ;;  %1290 = vmatpush3.msra.mxu1 %v463_v59 }
 0x3b5   : > { %1299 = vmatprep.subr.mxu1 %v1596_v1 }
 0x3ba   : > { %v1421_v61 = vpop.eup %1420 }
 0x3bb   : > { %v461_v62 = vmul.f32 %v1421_v61, %v1413_v45  ;;  %v972_v63 = vpop.xlane.xlu1 %971 }
 0x3bc   : > { %1424 = vrcp.f32 %v972_v63 }
 0x3bd   : > { %539 = vst.msk [vmem:[%s1851_s7] sm:$0xff] %vm376_vm2, %v461_v62  ;;  %1292 = vmatmul.mubr.msk.f32.vlgmr.msra.gmra.mrb[2].mxu1 %vm376_vm2, %v461_v62 }
 0x3be   : > { %v1423_v0 = vpop.eup %1422  ;;  %1300 = vmatpush3.msra.mxu1 %v630_v57  ;;  %1301 = vmatprep.mubr.msk.f32.mxu1 %vm1595_vm0, %v1596_v1 }
 0x3bf   : > { %v628_v2 = vmul.f32 %v1423_v0, %v1415_v48  ;;  %v803_v3 = vpop.permute.xlu1 %802  ;;  %1309 = vmatprep.subr.mxu1 %v1596_v1 }
 0x3c1   : > { %1235 = vst.msk [vmem:[%s1851_s7 + $0x8] sm:$0xff] %vm376_vm2, %v628_v2  ;;  %1302 = vmatmul.mubr.msk.f32.vlgmr.msra.gmra.mrb[4].mxu1 %vm376_vm2, %v628_v2 }
 0x3c2   : > { %1310 = vmatpush3.msra.mxu1 %v803_v3  ;;  %1311 = vmatprep.mubr.msk.f32.mxu1 %vm1595_vm0, %v1596_v1 }
 0x3c3   : > { %1319 = vmatprep.subr.mxu1 %v1596_v1 }
 0x3c6   : > { %v1425_v4 = vpop.eup %1424 }
 0x3c7   : > { %v974_v5 = vmul.f32 %v1425_v4, %v1417_v50 }
 0x3c9   : > { %1243 = vst.msk [vmem:[%s1851_s7 + $0x18] sm:$0xff] %vm376_vm2, %v974_v5 }
 0x3e4   : > { %v799_v6 = vpop.xlane.xlu0 %798 }
 0x3e5   : > { %1426 = vrcp.f32 %v799_v6 }
 0x3e8   : > { %v976_v9 = vpop.permute.xlu0 %975 }
 0x3ef   : > { %v1427_v7 = vpop.eup %1426 }
 0x3f0   : > { %v801_v8 = vmul.f32 %v1427_v7, %v1419_v55 }
 0x3f2   : > { %1239 = vst.msk [vmem:[%s1851_s7 + $0x10] sm:$0xff] %vm376_vm2, %v801_v8  ;;  %1312 = vmatmul.mubr.msk.f32.vlgmr.msra.gmra.mrb[6].mxu1 %vm376_vm2, %v801_v8 }
 0x3f3   : > { %1320 = vmatpush3.msra.mxu1 %v976_v9  ;;  %1321 = vmatprep.mubr.msk.f32.mxu1 %vm1595_vm0, %v1596_v1 }
 0x3f6   : > { %1322 = vmatmul.mubr.msk.f32.vlgmr.msra.gmra.mrb[8].mxu1 %vm376_vm2, %v974_v5 }
 0x490   : > { %v534_v10 = vpop.f32.mrb[2].mxu1 }
 0x491   : > { %538 = vst.msk [vmem:[%s1875_s15] sm:$0xff] %vm376_vm2, %v534_v10  ;;  %v1293_v11 = vpop.f32.mrb[3].mxu1 }
 0x494   : > { %v701_v12 = vpop.f32.mrb[4].mxu1 }
 0x495   : > { %706 = vrot.lane.b32.xlu1 %v701_v12, %s1608_s11  ;;  %v1303_v13 = vpop.f32.mrb[5].mxu1 }
 0x496   : > { %1499 = shalt.err (!%p1496_p9)
}
 0x497   : > { %s1500_s14 = scalar_lea.hbm %s1885_s28, 512  ;;  %s1504_s12 = scalar_lea.hbm %s1971_s5, 1024 }
 0x498   : > { %p1501_p2 = scmp.ne.s32.totalorder %s1885_s28, %s1500_s14  ;;  %p1505_p11 = scmp.lt.u32.totalorder %s1885_s28, %s1971_s5 }
 0x499   : > { %p1506_p1 = scmp.lt.u32.totalorder %s1504_s12, %s1500_s14  ;;  %p1508_p6 = scmp.lt.u32.totalorder %s1500_s14, %s1885_s28 }
 0x49a   : > { %p1502_p5 = pnand %p1501_p2, %p1735_p12 }
 0x49b   : > { %p1507_p4 = por %p1506_p1, %p1505_p11 }
 0x49c   : > { %p1503_p0 = pneg %p1502_p5 }
 0x49d   : > { %p1509_p8 = por %p1508_p6, %p1507_p4 }
 0x49f   : > { %p1510_p10 = pnand %p1509_p8, %p1503_p0 }
 0x4a1   : > { %1513 = shalt.err (!%p1510_p10)
}
 0x4a2   : > { %s1610_s23 = smov 128   ;;  %s1611_s27 = smov 16   ;;  %vm709_vm3 = vcmask 130112   ;;  %vm882_vm4 = vcmask 195712   ;;  %vm1055_vm5 = vcmask 261312  }
 0x4a3   : > { %1337 = dma.vmem_to_hbm [thread:$0]  (%p1735_p12), %s1887_s10, 512, %s1885_s28, %s1065_s17, %s1610_s23, %s1610_s23, %s1608_s11  }
 0x4a4   : > { %s1612_s24 = smov 24   ;;  %s1246_s26 = sshll.u32 %s1665_s22, 7 }
 0x4a5   : > { %s1078_s14 = sshll.u32 %s1875_s15, 4  ;;  %s1921_s28 = scalar_lea.hbm %s1970_s4, %s1246_s26  ;;  %s1923_s14 = int_to_ptr.vmem [resolvable:$true] %s1078_s14 }
 0x4a6   : > { %s1060_s17 = scalar_lea.sflag [#allocation4], %s1780_s16  ;;  %s1514_s6 = scalar_lea.vmem %s1923_s14, 128 }
 0x4a7   : > { %p1515_p13 = scmp.ne.s32.totalorder %s1923_s14, %s1514_s6  ;;  %s1613_s22 = smov [#allocation7]  }
 0x4a8   : > { %s1518_s7 = sshll.u32 %s1613_s22, 4  ;;  %s1519_s7 = int_to_ptr.vmem [resolvable:$false] %s1518_s7 }
 0x4a9   : > { %p1516_p3 = pnand %p1515_p13, %p1735_p12  ;;  %s1520_s12 = scalar_lea.vmem %s1519_s7, 256 }
 0x4aa   : > { %p1521_p9 = scmp.lt.s32.totalorder %s1923_s14, %s1519_s7  ;;  %p1522_p2 = scmp.lt.s32.totalorder %s1520_s12, %s1514_s6 }
 0x4ab   : > { %p1517_p7 = pneg %p1516_p3 }
 0x4ac   : > { %p1523_p5 = por %p1522_p2, %p1521_p9 }
 0x4ae   : > { %p1524_p0 = pnand %p1523_p5, %p1517_p7 }
 0x4c5   : > { %v874_v1 = vpop.f32.mrb[6].mxu1 }
 0x4c6   : > { %879 = vrot.lane.b32.xlu0 %v874_v1, %s1611_s27  ;;  %v1313_v14 = vpop.f32.mrb[7].mxu1 }
 0x4c9   : > { %v1047_v15 = vpop.f32.mrb[8].mxu1 }
 0x4ca   : > { %1052 = vrot.lane.b32.xlu1 %v1047_v15, %s1612_s24  ;;  %v1323_v16 = vpop.f32.mrb[9].mxu1 }
 0x507   : > { %v707_v17 = vpop.permute.xlu1 %706 }
 0x508   : > { %710 = vst.msk [vmem:[%s1875_s15] sm:$0xff] %vm709_vm3, %v707_v17 }
 0x538   : > { %v880_v18 = vpop.permute.xlu0 %879 }
 0x539   : > { %883 = vst.msk [vmem:[%s1875_s15] sm:$0xff] %vm882_vm4, %v880_v18 }
 0x53c   : > { %v1053_v19 = vpop.permute.xlu1 %1052 }
 0x53d   : > { %1056 = vst.msk [vmem:[%s1875_s15] sm:$0xff] %vm1055_vm5, %v1053_v19 }
 0x53e   : > { %1527 = shalt.err (!%p1524_p0)
}
 0x53f   : > { %s1528_s16 = scalar_lea.hbm %s1921_s28, 128  ;;  %s1532_s13 = scalar_lea.hbm %s1970_s4, 256 }
 0x540   : > { %p1529_p11 = scmp.ne.s32.totalorder %s1921_s28, %s1528_s16  ;;  %p1533_p6 = scmp.lt.u32.totalorder %s1921_s28, %s1970_s4 }
 0x541   : > { %p1534_p8 = scmp.lt.u32.totalorder %s1532_s13, %s1528_s16  ;;  %p1536_p13 = scmp.lt.u32.totalorder %s1528_s16, %s1921_s28 }
 0x542   : > { %p1530_p1 = pnand %p1529_p11, %p1735_p12 }
 0x543   : > { %p1535_p10 = por %p1534_p8, %p1533_p6 }
 0x544   : > { %p1531_p4 = pneg %p1530_p1 }
 0x545   : > { %p1537_p3 = por %p1536_p13, %p1535_p10 }
 0x547   : > { %p1538_p7 = pnand %p1537_p3, %p1531_p4 }
 0x549   : > { %1541 = shalt.err (!%p1538_p7)
}
 0x54a   : > { %1336 = dma.vmem_to_hbm [thread:$0]  (%p1735_p12), %s1923_s14, 128, %s1921_s28, %s1060_s17  }
 0x54b PF: > { %s1106_s24 = sand.u32 1, %s1576_s18   ;;  %p1986_p9 = scmp.ne.s32.totalorder %s1976_s25, 0 }
 0x54c   : > { %p1987_p2 = scmp.ge.s32.totalorder %s1588_s21, 2  ;;  %s1107_s26 = scalar_lea.sflag [#allocation4], %s1106_s24 }
 0x54e   : > { %p1349_p5 = pnand %p1987_p2, %p1986_p9 }
 0x550   : > { %1567 = dma.done.wait (!%p1349_p5), %s1107_s26, 128  }
 0x551   : > { %1569 = vsyncadd (!%p1349_p5), %s1107_s26, 4294967168  ;;  %s1116_s11 = scalar_lea.sflag [#allocation9], %s1106_s24 }
 0x552   : > { %1571 = dma.done.wait (!%p1349_p5), %s1116_s11, 512  }
 0x553   : > { %1573 = vsyncadd (!%p1349_p5), %s1116_s11, 4294966784  ;;  %p23_p12 = scmp.ge.s32.totalorder %s1700_s30, 4   ;;  %s1988_s18 = smov %s1580_s19 }
 0x554   : > { %s1989_s19 = smov %s1584_s20  ;;  %s1990_s20 = smov %s1731_s8 }
 0x555   : > { %s1991_s21 = smov %s1700_s30  ;;  %25 = sbr.rel (!%p23_p12) target bundleno = 8 (0x8), region = 108 }
 0x55c   :  { %1121 = vsyncpa [#allocation3], 1 }
 0x55d   :  { %1123 = vsyncpa [#allocation3 + $0x1], 1 }
 0x55e   :  { %1124 = vsyncpa [#allocation6], 1 }
 0x55f   :  { %1125 = vsyncpa [#allocation4], 1 }
 0x560   :  { %1127 = vsyncpa [#allocation4 + $0x1], 1 }
 0x561   :  { %1128 = vsyncpa [#allocation9], 1 }
 0x562   :  { %1130 = vsyncpa [#allocation9 + $0x1], 1 }

</bundles_post_ra>
